<compile_context>
chip_gen: v7x
topology: tpu7x:2x2x1
jax: 0.10.0
libtpu: 0.0.40
codegen_flags: <defaults>
</compile_context>

<pallas_src>
import jax
import jax.numpy as jnp
from jax.experimental import pallas as pl
from jax.experimental.pallas import tpu as pltpu

_LANE = 128        # TPU lane width (fast axis)
_ROW_TILE = 512    # 512 x 128 x 4 B = 256 KiB per tile buffer


def _copy_kernel(q_ref, o_ref):
    # StaticQuery.forward() is `return self.queries` -> pure pass-through.
    o_ref[...] = q_ref[...]


def static_query_forward(queries: jax.Array) -> jax.Array:
    """Pallas equivalent of StaticQuery.forward(): returns the parameter tensor."""
    orig_shape = queries.shape
    dtype = queries.dtype
    n = queries.size

    # ---- lane-dense re-layout: flatten and view as (rows, 128) -------------
    flat = queries.reshape(-1)
    rows = -(-n // _LANE)                          # ceil(n / 128)

    if rows <= _ROW_TILE:
        rows_padded = rows                         # single full-array block
        grid = None
    else:
        rows_padded = -(-rows // _ROW_TILE) * _ROW_TILE
        grid = (rows_padded // _ROW_TILE,)

    padded_n = rows_padded * _LANE
    if padded_n != n:
        flat = jnp.pad(flat, (0, padded_n - n))
    x2d = flat.reshape(rows_padded, _LANE)

    out_shape = jax.ShapeDtypeStruct((rows_padded, _LANE), dtype)

    if grid is None:
        # Small parameter: one whole-array VMEM block, no grid, output aliased
        # to the input buffer.
        out2d = pl.pallas_call(
            _copy_kernel,
            out_shape=out_shape,
            input_output_aliases={0: 0},
        )(x2d)
    else:
        # Large parameter: pipeline lane-dense 512-row tiles; "parallel" lets
        # the grid axis shard across TensorCores (v7x has 2 TCs/chip).
        out2d = pl.pallas_call(
            _copy_kernel,
            out_shape=out_shape,
            grid=grid,
            in_specs=[pl.BlockSpec((_ROW_TILE, _LANE), lambda i: (i, 0))],
            out_specs=pl.BlockSpec((_ROW_TILE, _LANE), lambda i: (i, 0)),
            input_output_aliases={0: 0},
            compiler_params=pltpu.CompilerParams(
                dimension_semantics=("parallel",)),
        )(x2d)

    out = out2d.reshape(-1)
    if padded_n != n:
        out = out[:n]
    return out.reshape(orig_shape)


class StaticQueryPallas:
    """Minimal JAX counterpart of the PyTorch StaticQuery module."""

    def __init__(self, num_steps: int, query_dim: int, key: jax.Array):
        # torch.randn -> standard normal init, done deterministically from `key`.
        self.queries = jax.random.normal(
            key, (num_steps, query_dim), dtype=jnp.float32)
        # jit so the reshape/alias plumbing fuses and the aliased output can
        # reuse the intermediate buffer instead of forcing a fresh HBM copy.
        self._forward = jax.jit(static_query_forward)

    def __call__(self) -> jax.Array:
        return self._forward(self.queries)


def _check(num_steps: int, query_dim: int, key: jax.Array) -> None:
    module = StaticQueryPallas(num_steps, query_dim, key)
    expected = module.queries.copy()      # snapshot: aliasing-safe comparison
    out = jax.block_until_ready(module())
    assert out.shape == (num_steps, query_dim)
    assert out.dtype == jnp.float32
    assert bool(jnp.array_equal(out, expected))


if __name__ == "__main__":
    key = jax.random.PRNGKey(0)
    k0, k1, k2 = jax.random.split(key, 3)

    # Small shape consistent with the module (grid-free single-block path).
    _check(num_steps=8, query_dim=32, key=k0)
    # Element count not a multiple of 128 (exercises lane padding + unpad).
    _check(num_steps=5, query_dim=7, key=k1)
    # Larger parameter (exercises the tiled, "parallel", aliased path).
    _check(num_steps=1024, query_dim=256, key=k2)

    print("KERNEL_OK")
</pallas_src>

<mosaic_0001>
module attributes {stable_mosaic.version = 11 : i64} {
  func.func @_copy_kernel(%arg0: memref<2x128xf32, #tpu.memory_space<vmem>>, %arg1: memref<2x128xf32, #tpu.memory_space<vmem>>) attributes {dimension_semantics = [], scalar_prefetch = 0 : i64, scratch_operands = 0 : i64, tpu.core_type = #tpu.core_type<tc>} {
    %c0 = arith.constant 0 : index
    %c0_0 = arith.constant 0 : index
    %0 = vector.load %arg0[%c0, %c0_0] : memref<2x128xf32, #tpu.memory_space<vmem>>, vector<2x128xf32>
    %c0_1 = arith.constant 0 : index
    %c0_2 = arith.constant 0 : index
    %1 = vector.load %arg1[%c0_1, %c0_2] : memref<2x128xf32, #tpu.memory_space<vmem>>, vector<2x128xf32>
    tpu.vector_store %arg1[%c0_1, %c0_2], %0 {strides = array<i32>} : memref<2x128xf32, #tpu.memory_space<vmem>>, vector<2x128xf32>,
    return
  }
}

</mosaic_0001>

<bundles_post_ra>
// kernel: static_query_forward.1
= control target key start
LH: loop header
LB: loop body
LE: loop exit
PB: predicated region body
PF: predicated region fallthrough
CT: control target
= control target key end

     0   :  { %s30_s0 = inlined_call_operand.vmem [shape: f32[2,128], index: 0, kind: input, shape index: {}, may-alias: {0,1}]   ;;  %s31_s1 = inlined_call_operand.vmem [shape: f32[2,128], index: 1, kind: output, shape index: {}, may-alias: {0,1}]  }
   0x1   :  { %v8_v0 = vld [vmem:[%s30_s0] sm:$0x3] }
   0x2   :  { %9 = vst [vmem:[%s31_s1] sm:$0x3] %v8_v0 }

</bundles_post_ra>
